<compile_context>
chip_gen: v6e
topology: v6e:2x2x1
jax: 0.10.0
libtpu: 0.0.40
codegen_flags: <defaults>
</compile_context>

<pallas_src>
import jax
import jax.numpy as jnp
from jax.experimental import pallas as pl
from jax.experimental.pallas import tpu as pltpu


def _spatial_attention_kernel(x_ref, o_ref):
    """x_ref: (C, tm) block of the (N, C, H*W) input; o_ref: (1, tm) block."""
    m = jnp.max(x_ref[...], axis=0, keepdims=True)            # (1, tm), input dtype (XLU)
    o_ref[...] = jax.nn.sigmoid(m.astype(jnp.float32)).astype(o_ref.dtype)  # EUP


def _vmem_capacity_bytes():
    """Physical VMEM per TensorCore; conservative (v7x) fallback if unknown."""
    try:
        info = pltpu.get_tpu_info()
        cap = getattr(info, "vmem_capacity_bytes", None)
        if cap:
            return int(cap)
    except Exception:
        pass
    return 64 << 20  # v7x-sized fallback keeps the tiling safe everywhere


def _pick_tile(n, c, hw, in_itemsize, out_itemsize, footprint_cap):
    """Largest lane-aligned tm whose double-buffered footprint fits the cap,
    backed off so the grid keeps >= 4 total steps when possible."""
    if hw < 128:
        return hw  # below lane width: full-extent block is the only legal shape
    hw_padded = ((hw + 127) // 128) * 128
    # Bytes per lane-column: double-buffered input + double-buffered output
    # (output tile padded to 8 sublanes).
    per_lane = 2 * c * in_itemsize + 2 * 8 * out_itemsize
    tm = (footprint_cap // per_lane) // 128 * 128
    tm = max(128, min(tm, hw_padded))
    # Keep at least ~4 grid steps (pipelining + both TCs on v7x) when possible.
    min_steps = 4
    while tm > 128 and n * pl.cdiv(hw, tm) < min_steps:
        tm = max(128, ((tm // 2) // 128) * 128)
    return tm


def spatial_attention(x_nchw):
    """x_nchw: (N, C, H, W) -> (N, 1, H, W) = sigmoid(max over channel dim)."""
    N, C, H, W = x_nchw.shape
    HW = H * W
    in_itemsize = jnp.dtype(x_nchw.dtype).itemsize
    out_itemsize = in_itemsize

    vmem_cap = _vmem_capacity_bytes()
    # Double-buffered footprint cap: ~24 MiB on 64 MiB parts, ~56 MiB on 128 MiB.
    footprint_cap = max(16 << 20, vmem_cap // 2 - (8 << 20))

    tm = _pick_tile(N, C, HW, in_itemsize, out_itemsize, footprint_cap)
    grid = (N, pl.cdiv(HW, tm))
    x2 = x_nchw.reshape(N, C, HW)

    # Honest VMEM estimate: double-buffered input + double-buffered padded
    # output + headroom; clamped to physical VMEM minus compiler scratch.
    honest_bytes = 2 * C * tm * in_itemsize + 2 * 8 * tm * out_itemsize + (4 << 20)
    vmem_limit = int(min(max(honest_bytes, 32 << 20), vmem_cap - (8 << 20)))

    cost = pl.CostEstimate(
        flops=N * C * HW,                    # channel-max comparisons
        transcendentals=N * HW,              # sigmoid
        bytes_accessed=N * C * HW * in_itemsize + N * HW * out_itemsize,
    )

    out = pl.pallas_call(
        _spatial_attention_kernel,
        out_shape=jax.ShapeDtypeStruct((N, 1, HW), x_nchw.dtype),
        grid=grid,
        in_specs=[pl.BlockSpec((None, C, tm), lambda n, m: (n, 0, m))],
        out_specs=pl.BlockSpec((None, 1, tm), lambda n, m: (n, 0, m)),
        compiler_params=pltpu.CompilerParams(
            dimension_semantics=("parallel", "parallel"),
            vmem_limit_bytes=vmem_limit,
        ),
        cost_estimate=cost,
    )(x2)
    return out.reshape(N, 1, H, W)


if __name__ == "__main__":
    key = jax.random.PRNGKey(0)
    N, C, H, W = 2, 4, 16, 16
    x = jax.random.normal(key, (N, C, H, W), jnp.float32)

    out = jax.jit(spatial_attention)(x)
    out = jax.block_until_ready(out)

    # Reference check against the module's forward semantics.
    ref = jax.nn.sigmoid(jnp.max(x, axis=1, keepdims=True))
    assert out.shape == (N, 1, H, W)
    assert bool(jnp.isfinite(out).all())
    assert bool(jnp.allclose(out, ref, atol=1e-6, rtol=1e-6))
    print("KERNEL_OK")
</pallas_src>

<mosaic_0001>
module attributes {stable_mosaic.version = 11 : i64} {
  func.func @_spatial_attention_kernel(%arg0: i32, %arg1: i32, %arg2: memref<1x4x128xf32, #tpu.memory_space<vmem>>, %arg3: memref<1x1x128xf32, #tpu.memory_space<vmem>>) attributes {dimension_semantics = [#tpu.dimension_semantics<parallel>, #tpu.dimension_semantics<parallel>], iteration_bounds = array<i64: 2, 2>, scalar_prefetch = 0 : i64, scratch_operands = 0 : i64, tpu.core_type = #tpu.core_type<tc>, window_params = [{transform_indices = @transform_0, window_bounds = array<i64: 1, 4, 128>}, {transform_indices = @transform_1, window_bounds = array<i64: 1, 1, 128>}]} {
    %c0 = arith.constant 0 : index
    %c0_0 = arith.constant 0 : index
    %c0_1 = arith.constant 0 : index
    %0 = vector.load %arg2[%c0, %c0_0, %c0_1] : memref<1x4x128xf32, #tpu.memory_space<vmem>>, vector<1x4x128xf32>
    %1 = vector.shape_cast %0 : vector<1x4x128xf32> to vector<4x128xf32>
    %cst = arith.constant dense<0xFF800000> : vector<128xf32>
    %2 = vector.multi_reduction <maximumf>, %1, %cst [0] : vector<4x128xf32> to vector<128xf32>
    %3 = vector.shape_cast %2 : vector<128xf32> to vector<1x128xf32>
    %4 = arith.negf %3 : vector<1x128xf32>
    %5 = math.exp %4 : vector<1x128xf32>
    %cst_2 = arith.constant 1.000000e+00 : f32
    %6 = vector.broadcast %cst_2 : f32 to vector<1x128xf32>
    %7 = arith.addf %6, %5 : vector<1x128xf32>
    %8 = arith.divf %6, %7 : vector<1x128xf32>
    %c0_3 = arith.constant 0 : index
    %c0_4 = arith.constant 0 : index
    %c0_5 = arith.constant 0 : index
    %9 = vector.load %arg3[%c0_3, %c0_4, %c0_5] : memref<1x1x128xf32, #tpu.memory_space<vmem>>, vector<1x1x128xf32>
    %10 = vector.shape_cast %9 : vector<1x1x128xf32> to vector<1x128xf32>
    %11 = vector.shape_cast %8 : vector<1x128xf32> to vector<1x1x128xf32>
    tpu.vector_store %arg3[%c0_3, %c0_4, %c0_5], %11 {strides = array<i32>} : memref<1x1x128xf32, #tpu.memory_space<vmem>>, vector<1x1x128xf32>,
    return
  }
  func.func @transform_0(%arg0: i32, %arg1: i32) -> (i32, i32, i32) {
    %c0_i32 = arith.constant 0 : i32
    %c0_i32_0 = arith.constant 0 : i32
    return %arg0, %c0_i32, %arg1 : i32, i32, i32
  }
  func.func @transform_1(%arg0: i32, %arg1: i32) -> (i32, i32, i32) {
    %c0_i32 = arith.constant 0 : i32
    %c0_i32_0 = arith.constant 0 : i32
    return %arg0, %c0_i32, %arg1 : i32, i32, i32
  }
}

</mosaic_0001>

<bundles_post_ra>
// kernel: spatial_attention.1
= control target key start
LH: loop header
LB: loop body
LE: loop exit
PB: predicated region body
PF: predicated region fallthrough
CT: control target
= control target key end

     0   :  { %s347_s6 = smov 0   ;;  %s349_s7 = smov 0   ;;  %s398_s0 = inlined_call_operand.vmem [shape: f32[2,4,256], index: 0, kind: input, shape index: {}]   ;;  %s399_s1 = inlined_call_operand.vmem [shape: f32[2,1,256], index: 1, kind: output, shape index: {}]  }
   0x1   :  { %s351_s8 = smov 0   ;;  %s353_s9 = smov 0  }
   0x2   :  { %s355_s10 = smov 0  }
   0x3 LB: > { %s20_s11 = sadd.s32 1, %s327_s8  ;;  %s23_s12 = sadd.s32 1, %s331_s9  ;;  %s335_s10 = sphi %s355_s10, %s11_s10   ;;  %s331_s9 = sphi %s353_s9, %s403_s9   ;;  %s327_s8 = sphi %s351_s8, %s402_s8   ;;  %s323_s7 = sphi %s349_s7, %s401_s7   ;;  %s319_s6 = sphi %s347_s6, %s400_s6  }
   0x4   : > { %p21_p0 = scmp.ge.s32.totalorder %s20_s11, 2  ;;  %p246_p1 = scmp.ge.s32.totalorder %s335_s10, 1 }
   0x5   : > { %p106_p2 = scmp.lt.s32.totalorder %s335_s10, 5 }
   0x6   : > { %s405_s11 = smov (%p21_p0, %s20_s11), 0  ;;  %s407_s12 = smov (!%p21_p0, %s23_s12), %s331_s9 }
   0x7   : > { %p107_p3 = pnand %p246_p1, %p106_p2  ;;  %p25_p4 = scmp.ge.s32.totalorder %s407_s12, 2 }
   0x8   : > { %p131_p5 = scmp.lt.s32.totalorder (!%p107_p3), %s323_s7, 1  ;;  %p133_p6 = scmp.lt.s32.totalorder (!%p107_p3), %s319_s6, 1 }
   0x9   : > { %s409_s12 = smov (%p25_p4, %s407_s12), 0  ;;  %110 = sbr.rel (%p107_p3) target bundleno = 66 (0x42), region = 24 }
   0xe   : > { %s411_s7 = smov (!%p131_p5, %s323_s7), 1  ;;  %s413_s6 = smov (!%p133_p6, %s319_s6), 1  ;;  %vm147_vm0 = vcmask 1043456  }
   0xf   : > { %s247_s13 = sshll.u32 %s411_s7, 1 }
  0x10   : > { %s136_s14 = sadd.s32 %s247_s13, %s413_s6 }
  0x11   : > { %s248_s15 = sshll.u32 %s136_s14, 2  ;;  %s145_s21 = scalar_lea.vmem %s399_s1, %s136_s14 }
  0x12   : > { %s138_s18 = scalar_lea.vmem %s398_s0, %s248_s15 }
  0x13   : > { %v146_v0 = vld [vmem:[%s138_s18] sm:$0xf] }
  0x14   : > { %v148_v1 = vsel %vm147_vm0, %v146_v0, -inf }
  0x15   : > { %v149_v2 = vrot.slane %v148_v1, 4 }
  0x17   : > { %v150_v3 = vmax.f32 %v148_v1, %v149_v2 }
  0x19   : > { %v151_v4 = vrot.slane %v150_v3, 2 }
  0x1b   : > { %v152_v5 = vmax.f32 %v150_v3, %v151_v4 }
  0x1d   : > { %v153_v6 = vrot.slane %v152_v5, 1 }
  0x1f   : > { %v154_v7 = vmax.f32 %v152_v5, %v153_v6 }
  0x21   : > { %v250_v8 = vmul.f32 -1.442695, %v154_v7 }
  0x23   : > { %293 = vpow2.f32 %v250_v8 }
  0x30   : > { %v294_v9 = vpop.eup %293 }
  0x31   : > { %v158_v10 = vadd.f32 1.0, %v294_v9 }
  0x33   : > { %295 = vrcp.f32 %v158_v10 }
  0x40   : > { %v296_v11 = vpop.eup %295 }
  0x41   : > { %161 = vst [vmem:[%s145_s21] sm:$0x1] %v296_v11 }
  0x42 PF: > { %s11_s10 = sadd.s32 1, %s335_s10   ;;  %s400_s6 = smov %s327_s8 }
  0x43   : > { %p8_p7 = scmp.ge.s32.totalorder %s11_s10, 6   ;;  %s401_s7 = smov %s331_s9 }
  0x44   : > { %s402_s8 = smov %s405_s11  ;;  %s403_s9 = smov %s409_s12 }
  0x45   :  { %10 = sbr.rel (!%p8_p7) target bundleno = 3 (0x3), region = 54 }

</bundles_post_ra>
